<compile_context>
chip_gen: v7x
topology: tpu7x:2x2x1
jax: 0.10.0
libtpu: 0.0.40
codegen_flags: <defaults>
</compile_context>

<pallas_src>
import functools

import jax
import jax.numpy as jnp
from jax.experimental import pallas as pl
from jax.experimental.pallas import tpu as pltpu

NEG_SLOPE = 0.01   # nn.LeakyReLU default negative_slope
BN_EPS = 1e-5      # nn.BatchNorm2d default eps
LANE = 128


# ------------------------------ helpers ---------------------------------

def _round_up(x, m):
    return (x + m - 1) // m * m


def _coutp_for(cout):
    # Lane-dense (128) stores only pay off when the padding overhead is modest.
    return _round_up(cout, LANE) if cout >= 64 else cout


def _largest_divisor_leq(n, cap):
    best = 1
    for d in range(1, min(n, cap) + 1):
        if n % d == 0:
            best = d
    return best


def _pick_conv_row_tile(hp, wpad, cinp, coutp, out_bytes,
                        budget_bytes=24 << 20, cap_rows=4096):
    """Largest divisor TH of hp such that M = TH*wpad is a multiple of 8 and the
    per-tile VMEM footprint (f32 acc + double-buffered out + LHS scratch) stays within
    budget; falls back to the full height (block == full dim is always legal)."""
    per_row = coutp * 4 + 2 * coutp * out_bytes + 3 * cinp * 2
    max_rows = max(8, min(cap_rows, budget_bytes // max(per_row, 1)))
    best = None
    for d in range(1, hp + 1):
        if hp % d == 0 and d * wpad <= max_rows and (d * wpad) % 8 == 0:
            best = d
    if best is None:
        for d in range(1, hp + 1):
            if hp % d == 0 and (d * wpad) % 8 == 0:
                best = d
                break
    return best if best is not None else hp


# ---------------------------- Pallas kernels ----------------------------

def _maxpool2x2_kernel(x_ref, o_ref, *, c):
    # x_ref: (THp, 2, Wp, 2*c) where the "2" is the H pair and the last dim packs
    # [w-even channels | w-odd channels]. o_ref: (THp, Wp, c).
    x = x_ref[...]
    m = jnp.maximum(x[:, 0], x[:, 1])                                 # H pair
    o_ref[...] = jnp.maximum(m[..., :c], m[..., c:]).astype(o_ref.dtype)  # W pair


def _conv3x3_bn_lrelu_kernel(x_ref, w_ref, b_ref, o_ref, lhs_ref, acc_ref,
                             *, m, wpad, cin):
    # x_ref : ((Hp+2)*Wpad + 8, Cin)  whole padded image, resident across row tiles
    # w_ref : (3, 3*Cin, CoutP)       BN-scaled weights, one (3*Cin, CoutP) slab per dy
    # b_ref : (1, CoutP)              folded conv-bias + BN shift
    # o_ref : (M, CoutP)              one row tile of the padded-width output
    t = pl.program_id(1)
    base = t * m
    if m % 8 == 0:
        base = pl.multiple_of(base, 8)

    # 3x3 conv as 3 MXU matmuls with K = 3*Cin: for each vertical tap dy, gather the
    # three width-shifted row slices into a contiguous (M, 3*Cin) LHS in VMEM.
    for dy in range(3):
        start = base + dy * wpad
        for dx in range(3):
            lhs_ref[:, dx * cin:(dx + 1) * cin] = x_ref[pl.ds(start + dx, m), :]
        contrib = jnp.dot(lhs_ref[...], w_ref[dy],
                          preferred_element_type=jnp.float32)
        if dy == 0:
            acc_ref[...] = contrib
        else:
            acc_ref[...] += contrib

    # Folded conv-bias + BatchNorm affine, then LeakyReLU.
    y = acc_ref[...] + b_ref[...]
    y = jnp.where(y >= 0, y, NEG_SLOPE * y)
    o_ref[...] = y.astype(o_ref.dtype)


# ------------------------------ wrappers --------------------------------

def maxpool2x2(x_nhwc, out_dtype):
    """nn.MaxPool2d(2) on NHWC input (floor division of spatial dims)."""
    B, H, W, C = x_nhwc.shape
    Hp, Wp = H // 2, W // 2
    x = x_nhwc[:, :2 * Hp, :2 * Wp, :]                 # PyTorch floor behaviour
    # Free row-major reshape: (B, 2Hp, 2Wp, C) -> (B, Hp, 2, Wp, 2C).
    x6 = x.reshape(B, Hp, 2, Wp, 2 * C)
    THp = _largest_divisor_leq(Hp, max(1, 2048 // max(Wp, 1)))
    return pl.pallas_call(
        functools.partial(_maxpool2x2_kernel, c=C),
        out_shape=jax.ShapeDtypeStruct((B, Hp, Wp, C), out_dtype),
        grid=(B, Hp // THp),
        in_specs=[pl.BlockSpec((None, THp, 2, Wp, 2 * C),
                               lambda b, t: (b, t, 0, 0, 0))],
        out_specs=pl.BlockSpec((None, THp, Wp, C), lambda b, t: (b, t, 0, 0)),
        compiler_params=pltpu.CompilerParams(
            dimension_semantics=("parallel", "parallel")),
    )(x6)


def _pad_activation(x_nhwc, circular):
    """Zero-pad H by 1, circular/zero-pad W by 1, flatten rows, append 8 zero tail
    rows (so shifted in-kernel reads stay in-bounds).  Returns bf16."""
    B, hp, wp, c = x_nhwc.shape
    if circular:
        xw = jnp.concatenate(
            [x_nhwc[:, :, -1:, :], x_nhwc, x_nhwc[:, :, :1, :]], axis=2)
    else:
        xw = jnp.pad(x_nhwc, ((0, 0), (0, 0), (1, 1), (0, 0)))
    xp = jnp.pad(xw, ((0, 0), (1, 1), (0, 0), (0, 0)))
    flat = xp.reshape(B, (hp + 2) * (wp + 2), c)          # free row-major reshape
    flat = jnp.pad(flat, ((0, 0), (0, 8), (0, 0)))
    return flat.astype(jnp.bfloat16)


def _conv_block(x_flat, hp, wp, w, b, gamma, beta, rmean, rvar, out_dtype):
    """Conv2d(3x3, stride 1) + BatchNorm2d (inference) + LeakyReLU on a pre-padded,
    flattened bf16 activation (B, (hp+2)*(wp+2)+8, CinP).  Returns the padded-width,
    channel-padded layout (B, hp*(wp+2), CoutP)."""
    B, npad, cinp = x_flat.shape
    cout, cin_w = w.shape[0], w.shape[1]
    wpad = wp + 2
    coutp = _coutp_for(cout)
    out_bytes = jnp.dtype(out_dtype).itemsize

    # Fold conv bias + inference BatchNorm into the weights / one per-channel bias.
    scale = gamma / jnp.sqrt(rvar + BN_EPS)                              # (cout,)
    bias = beta + (b - rmean) * scale                                    # (cout,)
    wt = jnp.transpose(w, (2, 3, 1, 0)) * scale[None, None, None, :]     # (3,3,cin,cout)
    wt = jnp.pad(wt, ((0, 0), (0, 0), (0, cinp - cin_w), (0, coutp - cout)))
    wt = wt.reshape(3, 3 * cinp, coutp).astype(jnp.bfloat16)             # K = dx*CinP + c
    bias_p = jnp.pad(bias, (0, coutp - cout)).reshape(1, coutp).astype(jnp.float32)

    th = _pick_conv_row_tile(hp, wpad, cinp, coutp, out_bytes)
    nt = hp // th
    m = th * wpad

    est = (2 * npad * cinp * 2            # resident padded image (auto double-buffered)
           + 2 * 3 * 3 * cinp * coutp * 2 # resident weights
           + m * coutp * 4                # f32 accumulator
           + m * 3 * cinp * 2             # LHS gather scratch
           + 2 * m * coutp * out_bytes    # output double buffer
           + (2 << 20))
    vmem_limit = int(min(max(est * 1.4, 32 << 20), 100 << 20))

    kernel = functools.partial(_conv3x3_bn_lrelu_kernel, m=m, wpad=wpad, cin=cinp)
    return pl.pallas_call(
        kernel,
        out_shape=jax.ShapeDtypeStruct((B, hp * wpad, coutp), out_dtype),
        grid=(B, nt),
        in_specs=[
            # Whole padded image per batch element; the index map ignores the row-tile
            # axis, so the block stays resident across row tiles and the next image is
            # prefetched by the pipeline while this one is being computed.
            pl.BlockSpec((None, npad, cinp), lambda bb, t: (bb, 0, 0)),
            pl.BlockSpec((3, 3 * cinp, coutp), lambda bb, t: (0, 0, 0)),  # weights
            pl.BlockSpec((1, coutp), lambda bb, t: (0, 0)),               # bias
        ],
        out_specs=pl.BlockSpec((None, m, coutp), lambda bb, t: (bb, t, 0)),
        scratch_shapes=[
            pltpu.VMEM((m, 3 * cinp), jnp.bfloat16),   # (M, 3*Cin) LHS gather buffer
            pltpu.VMEM((m, coutp), jnp.float32),       # f32 accumulator
        ],
        compiler_params=pltpu.CompilerParams(
            dimension_semantics=("parallel", "parallel"),
            vmem_limit_bytes=vmem_limit),
    )(x_flat, wt, bias_p)


def down_cbr_forward(x_nchw, params, circular_padding, double_version):
    """down_CBR.forward: MaxPool2d(2) -> conv block(s). Input/output NCHW."""
    # Cast to bf16 before the layout transpose so it (and the pool) move half the bytes.
    x = jnp.transpose(x_nchw.astype(jnp.bfloat16), (0, 2, 3, 1))        # NCHW -> NHWC
    x = maxpool2x2(x, out_dtype=jnp.bfloat16)
    B, hp, wp, _ = x.shape

    y = _conv_block(_pad_activation(x, circular_padding), hp, wp,
                    params["w1"], params["b1"], params["g1"], params["be1"],
                    params["rm1"], params["rv1"],
                    out_dtype=jnp.bfloat16 if double_version else jnp.float32)
    cout = params["w1"].shape[0]
    coutp = _coutp_for(cout)

    if double_version:
        # Feed conv2 straight from conv1's padded-width layout: only the valid columns
        # are read by the pad step; padded channels are kept (conv2's weights are
        # zero-padded along Cin), so no slice/cast round trip over the intermediate.
        y_valid = y.reshape(B, hp, wp + 2, coutp)[:, :, :wp, :]
        y = _conv_block(_pad_activation(y_valid, circular_padding), hp, wp,
                        params["w2"], params["b2"], params["g2"], params["be2"],
                        params["rm2"], params["rv2"], out_dtype=jnp.float32)
        cout = params["w2"].shape[0]
        coutp = _coutp_for(cout)

    out = y.reshape(B, hp, wp + 2, coutp)[:, :, :wp, :cout]
    return jnp.transpose(out, (0, 3, 1, 2))                             # NHWC -> NCHW


def init_params(key, in_ch, out_ch):
    ks = jax.random.split(key, 12)
    f32 = jnp.float32
    return {
        # conv1 / bn1
        "w1": 0.1 * jax.random.normal(ks[0], (out_ch, in_ch, 3, 3), f32),
        "b1": 0.05 * jax.random.normal(ks[1], (out_ch,), f32),
        "g1": 1.0 + 0.1 * jax.random.normal(ks[2], (out_ch,), f32),
        "be1": 0.1 * jax.random.normal(ks[3], (out_ch,), f32),
        "rm1": 0.1 * jax.random.normal(ks[4], (out_ch,), f32),
        "rv1": 1.0 + 0.1 * jnp.abs(jax.random.normal(ks[5], (out_ch,), f32)),
        # conv2 / bn2
        "w2": 0.1 * jax.random.normal(ks[6], (out_ch, out_ch, 3, 3), f32),
        "b2": 0.05 * jax.random.normal(ks[7], (out_ch,), f32),
        "g2": 1.0 + 0.1 * jax.random.normal(ks[8], (out_ch,), f32),
        "be2": 0.1 * jax.random.normal(ks[9], (out_ch,), f32),
        "rm2": 0.1 * jax.random.normal(ks[10], (out_ch,), f32),
        "rv2": 1.0 + 0.1 * jnp.abs(jax.random.normal(ks[11], (out_ch,), f32)),
    }


if __name__ == "__main__":
    key = jax.random.PRNGKey(0)
    k_x, k_p = jax.random.split(key)

    B, IN_CH, OUT_CH, H, W = 2, 4, 8, 16, 16
    x = jax.random.normal(k_x, (B, IN_CH, H, W), jnp.float32)
    params = init_params(k_p, IN_CH, OUT_CH)

    # Exercise both branches of down_CBR.
    out_polar_double = down_cbr_forward(x, params, circular_padding=True,
                                        double_version=True)
    out_plain_single = down_cbr_forward(x, params, circular_padding=False,
                                        double_version=False)

    jax.block_until_ready(out_polar_double)
    jax.block_until_ready(out_plain_single)

    assert out_polar_double.shape == (B, OUT_CH, H // 2, W // 2)
    assert out_plain_single.shape == (B, OUT_CH, H // 2, W // 2)
    print("KERNEL_OK")
</pallas_src>

<mosaic_0001>
module attributes {stable_mosaic.version = 11 : i64} {
  func.func @_maxpool2x2_kernel(%arg0: i32, %arg1: i32, %arg2: memref<1x8x2x8x8xbf16, #tpu.memory_space<vmem>>, %arg3: memref<1x8x8x4xbf16, #tpu.memory_space<vmem>>) attributes {dimension_semantics = [#tpu.dimension_semantics<parallel>, #tpu.dimension_semantics<parallel>], iteration_bounds = array<i64: 2, 1>, scalar_prefetch = 0 : i64, scratch_operands = 0 : i64, tpu.core_type = #tpu.core_type<tc>, window_params = [{transform_indices = @transform_0, window_bounds = array<i64: 1, 8, 2, 8, 8>}, {transform_indices = @transform_1, window_bounds = array<i64: 1, 8, 8, 4>}]} {
    %c0 = arith.constant 0 : index
    %c0_0 = arith.constant 0 : index
    %c0_1 = arith.constant 0 : index
    %c0_2 = arith.constant 0 : index
    %c0_3 = arith.constant 0 : index
    %0 = vector.load %arg2[%c0, %c0_0, %c0_1, %c0_2, %c0_3] : memref<1x8x2x8x8xbf16, #tpu.memory_space<vmem>>, vector<1x8x2x8x8xbf16>
    %1 = vector.shape_cast %0 : vector<1x8x2x8x8xbf16> to vector<8x2x8x8xbf16>
    %2 = vector.extract_strided_slice %1 {offsets = [0, 0, 0, 0], sizes = [8, 1, 8, 8], strides = [1, 1, 1, 1]} : vector<8x2x8x8xbf16> to vector<8x1x8x8xbf16>
    %3 = vector.shape_cast %2 : vector<8x1x8x8xbf16> to vector<8x8x8xbf16>
    %4 = vector.extract_strided_slice %1 {offsets = [0, 1, 0, 0], sizes = [8, 1, 8, 8], strides = [1, 1, 1, 1]} : vector<8x2x8x8xbf16> to vector<8x1x8x8xbf16>
    %5 = vector.shape_cast %4 : vector<8x1x8x8xbf16> to vector<8x8x8xbf16>
    %6 = arith.maximumf %3, %5 : vector<8x8x8xbf16>
    %7 = vector.extract_strided_slice %6 {offsets = [0, 0, 0], sizes = [8, 8, 4], strides = [1, 1, 1]} : vector<8x8x8xbf16> to vector<8x8x4xbf16>
    %8 = vector.extract_strided_slice %6 {offsets = [0, 0, 4], sizes = [8, 8, 4], strides = [1, 1, 1]} : vector<8x8x8xbf16> to vector<8x8x4xbf16>
    %9 = arith.maximumf %7, %8 : vector<8x8x4xbf16>
    %c0_4 = arith.constant 0 : index
    %c0_5 = arith.constant 0 : index
    %c0_6 = arith.constant 0 : index
    %c0_7 = arith.constant 0 : index
    %10 = vector.load %arg3[%c0_4, %c0_5, %c0_6, %c0_7] : memref<1x8x8x4xbf16, #tpu.memory_space<vmem>>, vector<1x8x8x4xbf16>
    %11 = vector.shape_cast %10 : vector<1x8x8x4xbf16> to vector<8x8x4xbf16>
    %12 = vector.shape_cast %9 : vector<8x8x4xbf16> to vector<1x8x8x4xbf16>
    tpu.vector_store %arg3[%c0_4, %c0_5, %c0_6, %c0_7], %12 {strides = array<i32>} : memref<1x8x8x4xbf16, #tpu.memory_space<vmem>>, vector<1x8x8x4xbf16>,
    return
  }
  func.func @transform_0(%arg0: i32, %arg1: i32) -> (i32, i32, i32, i32, i32) {
    %c0_i32 = arith.constant 0 : i32
    %c0_i32_0 = arith.constant 0 : i32
    %c0_i32_1 = arith.constant 0 : i32
    %c0_i32_2 = arith.constant 0 : i32
    return %arg0, %arg1, %c0_i32, %c0_i32_0, %c0_i32_1 : i32, i32, i32, i32, i32
  }
  func.func @transform_1(%arg0: i32, %arg1: i32) -> (i32, i32, i32, i32) {
    %c0_i32 = arith.constant 0 : i32
    %c0_i32_0 = arith.constant 0 : i32
    %c0_i32_1 = arith.constant 0 : i32
    return %arg0, %arg1, %c0_i32, %c0_i32_0 : i32, i32, i32, i32
  }
}

</mosaic_0001>

<bundles_post_ra>
// kernel: tpu_custom_call.1
= control target key start
LH: loop header
LB: loop body
LE: loop exit
PB: predicated region body
PF: predicated region fallthrough
CT: control target
= control target key end

     0   :  { %6 = vsyncpa [#allocation3], 0  ;;  %s635_s0 = inlined_call_operand.hbm [shape: bf16[2,8,2,8,8], index: 0, kind: input, shape index: {}]   ;;  %s636_s1 = inlined_call_operand.vmem [shape: bf16[2,8,8,4], index: 1, kind: output, shape index: {}]  }
   0x1   :  { %8 = vsyncpa [#allocation3 + $0x1], 0  ;;  %s503_s6 = smov 0   ;;  %s505_s7 = smov 0  }
   0x2   :  { %s507_s8 = smov 0   ;;  %s509_s9 = smov 0  }
   0x3   :  { %s511_s10 = smov 0   ;;  %s513_s11 = smov 0  }
   0x4 LB: > { %s334_s12 = sadd.s32 4294967295, %s487_s11   ;;  %s26_s13 = sadd.s32 1, %s483_s10  ;;  %s487_s11 = sphi %s513_s11, %s14_s11   ;;  %s483_s10 = sphi %s511_s10, %s644_s10   ;;  %s479_s9 = sphi %s509_s9, %s643_s9   ;;  %s475_s8 = sphi %s507_s8, %s642_s8   ;;  %s471_s7 = sphi %s505_s7, %s641_s7   ;;  %s467_s6 = sphi %s503_s6, %s640_s6  }
   0x5   : > { %p28_p0 = scmp.ge.s32.totalorder %s26_s13, 2  ;;  %s35_s14 = sadd.s32 1, %s475_s8 }
   0x6   : > { %p42_p1 = scmp.ne.s32.totalorder %s475_s8, %s471_s7  ;;  %p43_p2 = scmp.eq.s32.totalorder %s487_s11, 0 }
   0x7   : > { %s646_s13 = smov (%p28_p0, %s26_s13), 0  ;;  %p48_p4 = scmp.ne.s32.totalorder %s471_s7, %s467_s6 }
   0x8   : > { %p539_p3 = por %p43_p2, %p42_p1  ;;  %s30_s16 = ssub.s32 %s483_s10, %s646_s13 }
   0x9   : > { %p49_p5 = scmp.eq.s32.totalorder %s334_s12, 0  ;;  %p33_p6 = scmp.eq.s32.totalorder %s30_s16, 0 }
   0xa   : > { %p355_p8 = scmp.lt.s32.totalorder %s487_s11, 2  ;;  %s100_s19 = sand.u32 1, %s475_s8  }
   0xb   : > { %p546_p7 = por %p49_p5, %p48_p4  ;;  %s347_s20 = sshll.u32 %s483_s10, 10 }
   0xc   : > { %s552_s18 = scalar_select %p33_p6, %s475_s8, %s35_s14  }
   0xd   : > { %s338_s21 = sshll.u32 %s100_s19, 6  ;;  %s559_s24 = scalar_lea.hbm %s635_s0, %s347_s20 }
   0xe   : > { %s104_s25 = scalar_lea.vmem [#allocation2], %s338_s21  ;;  %p563_p9 = pnand %p355_p8, %p539_p3 }
   0xf   : > { %s114_s26 = sshll.u32 %s104_s25, 4  ;;  %s569_s28 = scalar_lea.sflag [#allocation3], %s100_s19  ;;  %s567_s26 = int_to_ptr.vmem [resolvable:$true] %s114_s26 }
  0x10   : > { %s407_s29 = scalar_lea.hbm %s559_s24, 1024  ;;  %p409_p11 = pneg %p563_p9 }
  0x11   : > { %p408_p10 = scmp.ne.s32.totalorder %s559_s24, %s407_s29  ;;  %s412_s3 = scalar_lea.hbm %s635_s0, 2048 }
  0x12   : > { %p413_p0 = scmp.lt.u32.totalorder %s559_s24, %s635_s0  ;;  %p414_p1 = scmp.lt.u32.totalorder %s412_s3, %s407_s29 }
  0x13   : > { %p410_p12 = pnand %p409_p11, %p408_p10  ;;  %p416_p3 = scmp.lt.u32.totalorder %s407_s29, %s559_s24 }
  0x14   : > { %p415_p2 = por %p414_p1, %p413_p0 }
  0x15   : > { %p411_p13 = pneg %p410_p12 }
  0x16   : > { %p417_p4 = por %p416_p3, %p415_p2 }
  0x18   : > { %p418_p5 = pnand %p417_p4, %p411_p13 }
  0x1a   : > { %421 = shalt.err (!%p418_p5)
}
  0x1b   : > { %s422_s6 = scalar_lea.vmem %s567_s26, 1024  ;;  %s489_s12 = smov [#allocation2]  }
  0x1c   : > { %p423_p6 = scmp.ne.s32.totalorder %s567_s26, %s422_s6  ;;  %s427_s14 = sshll.u32 %s489_s12, 4  ;;  %s428_s14 = int_to_ptr.vmem [resolvable:$false] %s427_s14 }
  0x1d   : > { %s429_s15 = scalar_lea.vmem %s428_s14, 2048  ;;  %p430_p12 = scmp.lt.s32.totalorder %s567_s26, %s428_s14 }
  0x1e   : > { %p425_p8 = pnand %p423_p6, %p409_p11  ;;  %p431_p0 = scmp.lt.s32.totalorder %s429_s15, %s422_s6 }
  0x20   : > { %p426_p10 = pneg %p425_p8  ;;  %p432_p1 = por %p431_p0, %p430_p12 }
  0x22   : > { %p433_p2 = pnand %p432_p1, %p426_p10 }
  0x24   : > { %436 = shalt.err (!%p433_p2)
}
  0x25   : > { %s490_s16 = smov 64   ;;  %s491_s19 = smov 4  }
  0x26   : > { %354 = dma.hbm_to_vmem [thread:$0]  (!%p563_p9), %s559_s24, 1024, %s567_s26, %s569_s28, %s490_s16, %s490_s16, %s491_s19  }
  0x27   : > { %p341_p11 = scmp.ge.s32.totalorder %s487_s11, 1  ;;  %p122_p13 = scmp.lt.s32.totalorder %s487_s11, 3 }
  0x29   : > { %p123_p3 = pnand %p341_p11, %p122_p13 }
  0x2a   : > { %s128_s20 = sand.u32 (!%p123_p3), 1, %s471_s7  }
  0x2b   : > { %126 = sbr.rel (%p123_p3) target bundleno = 185 (0xb9), region = 24  ;;  %s342_s21 = sshll.u32 (!%p123_p3), %s128_s20, 6 }
  0x2c   : > { %s129_s22 = scalar_lea.sflag (!%p123_p3), [#allocation3], %s128_s20  ;;  %s132_s23 = scalar_lea.vmem (!%p123_p3), [#allocation2], %s342_s21 }
  0x32   : > { %462 = dma.done.wait (%p546_p7), %s129_s22, 1024  }
  0x33   : > { %464 = vsyncadd (%p546_p7), %s129_s22, 4294966272  ;;  %v170_v0 = vld [vmem:[%s132_s23 + $0x10] sm:$0xf]  ;;  %v171_v1 = vld [vmem:[%s132_s23 + $0x14] sm:$0xf]  ;;  %s492_s24 = smov 124  }
  0x34   : > { %v166_v2 = vld [vmem:[%s132_s23] sm:$0xf]  ;;  %v184_v3 = vmax.bf16 %v171_v1, %v170_v0  ;;  %v167_v4 = vld [vmem:[%s132_s23 + $0x4] sm:$0xf]  ;;  %v172_v5 = vld [vmem:[%s132_s23 + $0x18] sm:$0xf] }
  0x35   : > { %v173_v6 = vld [vmem:[%s132_s23 + $0x1c] sm:$0xf]  ;;  %v182_v7 = vmax.bf16 %v167_v4, %v166_v2  ;;  %v168_v8 = vld [vmem:[%s132_s23 + $0x8] sm:$0xf]  ;;  %v169_v9 = vld [vmem:[%s132_s23 + $0xc] sm:$0xf] }
  0x36   : > { %202 = vrot.lane.b32.xlu1 %v184_v3, %s492_s24  ;;  %v185_v10 = vmax.bf16 %v173_v6, %v172_v5  ;;  %v183_v11 = vmax.bf16 %v169_v9, %v168_v8  ;;  %v176_v12 = vld [vmem:[%s132_s23 + $0x28] sm:$0xf]  ;;  %v177_v13 = vld [vmem:[%s132_s23 + $0x2c] sm:$0xf]  ;;  %v174_v14 = vld [vmem:[%s132_s23 + $0x20] sm:$0xf] }
  0x37   : > { %198 = vrot.lane.b32.xlu0 %v182_v7, %s492_s24  ;;  %v175_v15 = vld [vmem:[%s132_s23 + $0x24] sm:$0xf]  ;;  %v187_v16 = vmax.bf16 %v177_v13, %v176_v12  ;;  %v180_v18 = vld [vmem:[%s132_s23 + $0x38] sm:$0xf]  ;;  %v181_v19 = vld [vmem:[%s132_s23 + $0x3c] sm:$0xf] }
  0x38   : > { %v186_v17 = vmax.bf16 %v175_v15, %v174_v14  ;;  %v178_v20 = vld [vmem:[%s132_s23 + $0x30] sm:$0xf]  ;;  %v179_v21 = vld [vmem:[%s132_s23 + $0x34] sm:$0xf]  ;;  %v189_v22 = vmax.bf16 %v181_v19, %v180_v18  ;;  %p157_p7 = scmp.lt.s32.totalorder %s479_s9, 1  ;;  %vm230_vm0 = vcmask 27648  }
  0x39   : > { %v188_v23 = vmax.bf16 %v179_v21, %v178_v20 }
  0x3a   : > { %204 = vrot.lane.b32.xlu1 %v185_v10, %s492_s24  ;;  %s648_s9 = smov (!%p157_p7, %s479_s9), 1 }
  0x3b   : > { %200 = vrot.lane.b32.xlu0 %v183_v11, %s492_s24  ;;  %s348_s17 = sshll.u32 %s648_s9, 5 }
  0x3c   : > { %s164_s27 = scalar_lea.vmem %s636_s1, %s348_s17 }
  0x3e   : > { %208 = vrot.lane.b32.xlu1 %v187_v16, %s492_s24 }
  0x3f   : > { %206 = vrot.lane.b32.xlu0 %v186_v17, %s492_s24 }
  0x42   : > { %212 = vrot.lane.b32.xlu1 %v189_v22, %s492_s24 }
  0x43   : > { %210 = vrot.lane.b32.xlu0 %v188_v23, %s492_s24 }
  0xa8   : > { %v203_v24 = vpop.permute.xlu1 %202 }
  0xa9   : > { %v224_v25 = vmax.bf16 %v203_v24, %v184_v3  ;;  %v199_v26 = vpop.permute.xlu0 %198 }
  0xaa   : > { %v222_v27 = vmax.bf16 %v199_v26, %v182_v7 }
  0xab   : > { %233 = vst.msk [vmem:[%s164_s27 + $0x8] sm:$0xf] %vm230_vm0, %v224_v25 }
  0xac   : > { %231 = vst.msk [vmem:[%s164_s27] sm:$0xf] %vm230_vm0, %v222_v27  ;;  %v205_v28 = vpop.permute.xlu1 %204 }
  0xad   : > { %v225_v29 = vmax.bf16 %v205_v28, %v185_v10  ;;  %v201_v30 = vpop.permute.xlu0 %200 }
  0xae   : > { %v223_v31 = vmax.bf16 %v201_v30, %v183_v11 }
  0xaf   : > { %234 = vst.msk [vmem:[%s164_s27 + $0xc] sm:$0xf] %vm230_vm0, %v225_v29 }
  0xb0   : > { %232 = vst.msk [vmem:[%s164_s27 + $0x4] sm:$0xf] %vm230_vm0, %v223_v31  ;;  %v209_v32 = vpop.permute.xlu1 %208 }
  0xb1   : > { %v227_v33 = vmax.bf16 %v209_v32, %v187_v16  ;;  %v207_v34 = vpop.permute.xlu0 %206 }
  0xb2   : > { %v226_v35 = vmax.bf16 %v207_v34, %v186_v17 }
  0xb3   : > { %236 = vst.msk [vmem:[%s164_s27 + $0x14] sm:$0xf] %vm230_vm0, %v227_v33 }
  0xb4   : > { %235 = vst.msk [vmem:[%s164_s27 + $0x10] sm:$0xf] %vm230_vm0, %v226_v35  ;;  %v213_v36 = vpop.permute.xlu1 %212 }
  0xb5   : > { %v229_v37 = vmax.bf16 %v213_v36, %v189_v22  ;;  %v211_v38 = vpop.permute.xlu0 %210 }
  0xb6   : > { %v228_v39 = vmax.bf16 %v211_v38, %v188_v23 }
  0xb7   : > { %238 = vst.msk [vmem:[%s164_s27 + $0x1c] sm:$0xf] %vm230_vm0, %v229_v37 }
  0xb8   : > { %237 = vst.msk [vmem:[%s164_s27 + $0x18] sm:$0xf] %vm230_vm0, %v228_v39 }
  0xb9 PF: > { %s14_s11 = sadd.s32 1, %s487_s11   ;;  %s640_s6 = smov %s471_s7 }
  0xba   : > { %p11_p9 = scmp.ge.s32.totalorder %s14_s11, 4   ;;  %s641_s7 = smov %s475_s8 }
  0xbb   : > { %s642_s8 = smov %s552_s18  ;;  %s643_s9 = smov %s483_s10 }
  0xbc   : > { %s644_s10 = smov %s646_s13  ;;  %13 = sbr.rel (!%p11_p9) target bundleno = 4 (0x4), region = 64 }
  0xc3   :  { %269 = vsyncpa [#allocation3], 1 }
  0xc4   :  { %271 = vsyncpa [#allocation3 + $0x1], 1 }

</bundles_post_ra>
